<compile_context>
chip_gen: v6e
topology: v6e:2x2x1
jax: 0.10.0
libtpu: 0.0.40
codegen_flags: <defaults>
</compile_context>

<pallas_src>
import jax
import jax.numpy as jnp
from jax import lax
from jax.experimental import pallas as pl
from jax.experimental.pallas import tpu as pltpu

# Model dims (mirroring the PyTorch module __init__ / forward)
VOCAB = 32          # vocab_size
EMBED = 16          # embed_dim
CONV_CH = 128       # conv1 out channels (fixed by module)
HIDDEN = 64         # LSTM hidden (fixed by module)
NUM_CLASSES = 4
OUT_PAD = 128       # lane-padded fc output width (sliced back to NUM_CLASSES in wrapper)
B = 2               # batch
T = 8               # sequence length
TB = T * B


def cnn_lstm_kernel(idp_ref, tab_ref, cb_ref, wih_ref, bias_ref, whh_ref,
                    fcw_ref, fcb_ref, out_ref):
    # ---- Embedding + Conv1d(EMBED->128, k=3, pad=1) fused:
    # one-hot(ids at time t+k-1) @ (emb_table @ conv_w[k]), summed over the 3 taps.
    idp = idp_ref[...]                                           # ((T+2)*B, 1) int32, time-major, 0-padded
    lane_v = lax.broadcasted_iota(jnp.int32, (TB, VOCAB), 1)     # vocab index per lane
    conv = jnp.zeros((TB, CONV_CH), jnp.float32)
    for k in range(3):
        idk = idp[k * B:k * B + TB, :]                           # ids at time t+k-1 (row r = t*B+b)
        oh = jnp.where(idk == lane_v, 1.0, 0.0).astype(jnp.bfloat16)   # (TB, VOCAB)
        conv = conv + jnp.dot(oh, tab_ref[k], preferred_element_type=jnp.float32)
    conv = jnp.maximum(conv + cb_ref[...], 0.0)                  # (TB, 128) f32, ReLU

    # ---- Hoisted input projection for ALL timesteps; bias (b_ih+b_hh) folded once.
    # Gate column order (reordered in prepare_kernel_params): [i | f | o | g].
    gates_x = jnp.dot(conv.astype(jnp.bfloat16), wih_ref[...],
                      preferred_element_type=jnp.float32) + bias_ref[...]   # (TB, 256) f32

    whh = whh_ref[...]                                           # (64, 256) bf16, [i|f|o|g]

    # Hoisted nonlinearity constants: sigmoid(x) = 0.5*tanh(0.5x)+0.5 on the [i,f,o]
    # lanes, plain tanh on the [g] lanes -> ONE EUP tanh per step for all four gates.
    is_sig = lax.broadcasted_iota(jnp.int32, (B, 4 * HIDDEN), 1) < 3 * HIDDEN
    pre = jnp.where(is_sig, 0.5, 1.0)
    post = jnp.where(is_sig, 0.5, 1.0)
    offs = jnp.where(is_sig, 0.5, 0.0)

    # ---- LSTM(128 -> 64), batch_first, h0 = c0 = 0; fully unrolled (T=8 static).
    # TODO(synk): on v5e one could additionally pin W_hh via pltpu.matmul_push_rhs /
    # matmul_acc_lhs; kept as a portable single fused dot per step.
    h = jnp.zeros((B, HIDDEN), jnp.float32)
    c = jnp.zeros((B, HIDDEN), jnp.float32)
    for t in range(T):
        gx_t = gates_x[t * B:(t + 1) * B, :]                     # one (B, 256) slab per step
        # dot first, then +gx_t so the add can ride the matmul result path (MRB on v7x).
        z = jnp.dot(h.astype(jnp.bfloat16), whh,
                    preferred_element_type=jnp.float32) + gx_t   # (B, 256) f32
        act = jnp.tanh(z * pre) * post + offs                    # all gates, one tanh
        i_g = act[:, 0 * HIDDEN:1 * HIDDEN]
        f_g = act[:, 1 * HIDDEN:2 * HIDDEN]
        o_g = act[:, 2 * HIDDEN:3 * HIDDEN]
        g_g = act[:, 3 * HIDDEN:4 * HIDDEN]
        c = f_g * c + i_g * g_g
        h = o_g * jnp.tanh(c)

    # ---- fc: Linear(64 -> num_classes), lane-padded to 128 for an unmasked store.
    out_ref[...] = (jnp.dot(h.astype(jnp.bfloat16), fcw_ref[...],
                            preferred_element_type=jnp.float32) + fcb_ref[...])


def init_params(key):
    # Canonical (f32) parameters, matching PyTorch semantics.
    ks = jax.random.split(key, 8)
    s = 0.1
    emb = s * jax.random.normal(ks[0], (VOCAB, EMBED), jnp.float32)
    emb = emb.at[0].set(0.0)                               # padding_idx=0 row is zero
    # conv1.weight in PyTorch is (128, EMBED, 3); stored pre-transposed as (3, EMBED, 128)
    conv_w = s * jax.random.normal(ks[1], (3, EMBED, CONV_CH), jnp.float32)
    conv_b = s * jax.random.normal(ks[2], (CONV_CH,), jnp.float32)
    wih = s * jax.random.normal(ks[3], (CONV_CH, 4 * HIDDEN), jnp.float32)   # W_ih^T
    whh = s * jax.random.normal(ks[4], (HIDDEN, 4 * HIDDEN), jnp.float32)    # W_hh^T
    b = s * jax.random.normal(ks[5], (4 * HIDDEN,), jnp.float32)             # b_ih + b_hh
    fcw = s * jax.random.normal(ks[6], (HIDDEN, NUM_CLASSES), jnp.float32)   # fc.weight^T
    fcb = s * jax.random.normal(ks[7], (NUM_CLASSES,), jnp.float32)
    return dict(emb=emb, conv_w=conv_w, conv_b=conv_b, wih=wih, whh=whh,
                b=b, fcw=fcw, fcb=fcb)


def _reorder_gates(w):
    # PyTorch gate blocks [i | f | g | o] -> kernel layout [i | f | o | g] (last axis).
    i, f, g, o = jnp.split(w, 4, axis=-1)
    return jnp.concatenate([i, f, o, g], axis=-1)


def prepare_kernel_params(params):
    # One-time layout / dtype plumbing for the kernel (done outside the jitted forward).
    kp = {}
    # Pre-compose embedding table with each conv tap: tab[k] = emb @ conv_w[k] (VOCAB,128).
    # Row 0 is exactly zero (padding_idx=0) so id-0 / padded positions contribute nothing.
    tab = jnp.einsum('ve,keo->kvo', params['emb'], params['conv_w'])
    kp['tab'] = tab.astype(jnp.bfloat16)                                   # (3, 32, 128)
    kp['cb'] = params['conv_b'].reshape(1, CONV_CH)                        # f32
    kp['wih'] = _reorder_gates(params['wih']).astype(jnp.bfloat16)         # (128, 256) [i,f,o,g]
    kp['bias'] = _reorder_gates(params['b']).reshape(1, 4 * HIDDEN)        # f32, folded once
    kp['whh'] = _reorder_gates(params['whh']).astype(jnp.bfloat16)         # (64, 256) [i,f,o,g]
    fcw_pad = jnp.zeros((HIDDEN, OUT_PAD), jnp.float32).at[:, :NUM_CLASSES].set(params['fcw'])
    kp['fcw'] = fcw_pad.astype(jnp.bfloat16)
    kp['fcb'] = jnp.zeros((1, OUT_PAD), jnp.float32).at[:, :NUM_CLASSES].set(
        params['fcb'].reshape(1, NUM_CLASSES))
    return kp


@jax.jit
def cnn_lstm_forward(x_ids, kparams):
    # Only integer-id plumbing stays outside the kernel: pad along T (conv padding=1)
    # and flatten time-major -> ((T+2)*B, 1).  Everything float is computed in-kernel.
    idp = jnp.pad(x_ids.T.astype(jnp.int32), ((1, 1), (0, 0))).reshape((T + 2) * B, 1)

    vmem = pl.BlockSpec(memory_space=pltpu.MemorySpace.VMEM)
    # NOTE: single invocation, no grid: the recurrence is latency-bound at B=2, so a
    # batch/core split (v7x megacore) would only add sync; footprint <150 KiB of VMEM.
    out_pad = pl.pallas_call(
        cnn_lstm_kernel,
        out_shape=jax.ShapeDtypeStruct((B, OUT_PAD), jnp.float32),
        in_specs=[vmem] * 8,
        out_specs=vmem,
    )(idp, kparams['tab'], kparams['cb'], kparams['wih'], kparams['bias'],
      kparams['whh'], kparams['fcw'], kparams['fcb'])
    return out_pad[:, :NUM_CLASSES]


def reference_forward(x_ids, params):
    # Pure-JAX f32 reference mirroring the PyTorch forward exactly.
    emb = params['emb'][x_ids]                             # (B, T, E)
    xp = jnp.pad(emb, ((0, 0), (1, 1), (0, 0)))
    conv = sum(jnp.einsum('bte,eo->bto', xp[:, k:k + T, :], params['conv_w'][k])
               for k in range(3)) + params['conv_b']
    conv = jnp.maximum(conv, 0.0)                          # (B, T, 128)
    h = jnp.zeros((B, HIDDEN), jnp.float32)
    c = jnp.zeros((B, HIDDEN), jnp.float32)
    for t in range(T):
        gates = conv[:, t, :] @ params['wih'] + h @ params['whh'] + params['b']
        i_g = jax.nn.sigmoid(gates[:, :HIDDEN])
        f_g = jax.nn.sigmoid(gates[:, HIDDEN:2 * HIDDEN])
        g_g = jnp.tanh(gates[:, 2 * HIDDEN:3 * HIDDEN])
        o_g = jax.nn.sigmoid(gates[:, 3 * HIDDEN:])
        c = f_g * c + i_g * g_g
        h = o_g * jnp.tanh(c)
    return h @ params['fcw'] + params['fcb']


if __name__ == "__main__":
    key = jax.random.PRNGKey(0)
    k_param, k_x = jax.random.split(key)
    params = init_params(k_param)
    kparams = prepare_kernel_params(params)
    x_ids = jax.random.randint(k_x, (B, T), 0, VOCAB, dtype=jnp.int32)

    out = cnn_lstm_forward(x_ids, kparams)
    out = jax.block_until_ready(out)

    ref = reference_forward(x_ids, params)
    assert out.shape == (B, NUM_CLASSES)
    # bf16 MXU operands -> slightly looser tolerance than a pure-f32 reference.
    assert jnp.allclose(out, ref, atol=2e-2, rtol=2e-2), (out, ref)
    print("KERNEL_OK")
</pallas_src>

<mosaic_0001>
module attributes {stable_mosaic.version = 11 : i64} {
  func.func @cnn_lstm_kernel(%arg0: memref<20x1xi32, #tpu.memory_space<vmem>>, %arg1: memref<3x32x128xbf16, #tpu.memory_space<vmem>>, %arg2: memref<1x128xf32, #tpu.memory_space<vmem>>, %arg3: memref<128x256xbf16, #tpu.memory_space<vmem>>, %arg4: memref<1x256xf32, #tpu.memory_space<vmem>>, %arg5: memref<64x256xbf16, #tpu.memory_space<vmem>>, %arg6: memref<64x128xbf16, #tpu.memory_space<vmem>>, %arg7: memref<1x128xf32, #tpu.memory_space<vmem>>, %arg8: memref<2x128xf32, #tpu.memory_space<vmem>>) attributes {dimension_semantics = [], scalar_prefetch = 0 : i64, scratch_operands = 0 : i64, tpu.core_type = #tpu.core_type<tc>} {
    %c0 = arith.constant 0 : index
    %c0_0 = arith.constant 0 : index
    %0 = vector.load %arg0[%c0, %c0_0] : memref<20x1xi32, #tpu.memory_space<vmem>>, vector<20x1xi32>
    %1 = tpu.iota {dimensions = array<i32: 1>} : vector<16x32xi32>
    %cst = arith.constant 0.000000e+00 : f32
    %2 = vector.broadcast %cst : f32 to vector<16x128xf32>
    %3 = vector.extract_strided_slice %0 {offsets = [0, 0], sizes = [16, 1], strides = [1, 1]} : vector<20x1xi32> to vector<16x1xi32>
    %4 = vector.broadcast %3 : vector<16x1xi32> to vector<16x32xi32>
    %5 = arith.cmpi eq, %4, %1 : vector<16x32xi32>
    %cst_1 = arith.constant 1.000000e+00 : f32
    %cst_2 = arith.constant 0.000000e+00 : f32
    %6 = vector.broadcast %cst_1 : f32 to vector<16x32xf32>
    %7 = vector.broadcast %cst_2 : f32 to vector<16x32xf32>
    %8 = arith.select %5, %6, %7 : vector<16x32xi1>, vector<16x32xf32>
    %9 = arith.truncf %8 : vector<16x32xf32> to vector<16x32xbf16>
    %c0_3 = arith.constant 0 : index
    %c0_4 = arith.constant 0 : index
    %c0_5 = arith.constant 0 : index
    %10 = vector.load %arg1[%c0_3, %c0_4, %c0_5] : memref<3x32x128xbf16, #tpu.memory_space<vmem>>, vector<1x32x128xbf16>
    %11 = vector.shape_cast %10 : vector<1x32x128xbf16> to vector<32x128xbf16>
    %cst_6 = arith.constant dense<0.000000e+00> : vector<16x128xf32>
    %12 = tpu.matmul %9, %11, %cst_6 {dimension_numbers = #tpu.dot_dimension_numbers<[1], [0], [0], [1], [0, 0, 1, 1], [], []>} : vector<16x32xbf16>, vector<32x128xbf16>, vector<16x128xf32> -> vector<16x128xf32>
    %13 = arith.addf %2, %12 : vector<16x128xf32>
    %14 = vector.extract_strided_slice %0 {offsets = [2, 0], sizes = [16, 1], strides = [1, 1]} : vector<20x1xi32> to vector<16x1xi32>
    %15 = vector.broadcast %14 : vector<16x1xi32> to vector<16x32xi32>
    %16 = arith.cmpi eq, %15, %1 : vector<16x32xi32>
    %cst_7 = arith.constant 1.000000e+00 : f32
    %cst_8 = arith.constant 0.000000e+00 : f32
    %17 = vector.broadcast %cst_7 : f32 to vector<16x32xf32>
    %18 = vector.broadcast %cst_8 : f32 to vector<16x32xf32>
    %19 = arith.select %16, %17, %18 : vector<16x32xi1>, vector<16x32xf32>
    %20 = arith.truncf %19 : vector<16x32xf32> to vector<16x32xbf16>
    %c1 = arith.constant 1 : index
    %c0_9 = arith.constant 0 : index
    %c0_10 = arith.constant 0 : index
    %21 = vector.load %arg1[%c1, %c0_9, %c0_10] : memref<3x32x128xbf16, #tpu.memory_space<vmem>>, vector<1x32x128xbf16>
    %22 = vector.shape_cast %21 : vector<1x32x128xbf16> to vector<32x128xbf16>
    %cst_11 = arith.constant dense<0.000000e+00> : vector<16x128xf32>
    %23 = tpu.matmul %20, %22, %cst_11 {dimension_numbers = #tpu.dot_dimension_numbers<[1], [0], [0], [1], [0, 0, 1, 1], [], []>} : vector<16x32xbf16>, vector<32x128xbf16>, vector<16x128xf32> -> vector<16x128xf32>
    %24 = arith.addf %13, %23 : vector<16x128xf32>
    %25 = vector.extract_strided_slice %0 {offsets = [4, 0], sizes = [16, 1], strides = [1, 1]} : vector<20x1xi32> to vector<16x1xi32>
    %26 = vector.broadcast %25 : vector<16x1xi32> to vector<16x32xi32>
    %27 = arith.cmpi eq, %26, %1 : vector<16x32xi32>
    %cst_12 = arith.constant 1.000000e+00 : f32
    %cst_13 = arith.constant 0.000000e+00 : f32
    %28 = vector.broadcast %cst_12 : f32 to vector<16x32xf32>
    %29 = vector.broadcast %cst_13 : f32 to vector<16x32xf32>
    %30 = arith.select %27, %28, %29 : vector<16x32xi1>, vector<16x32xf32>
    %31 = arith.truncf %30 : vector<16x32xf32> to vector<16x32xbf16>
    %c2 = arith.constant 2 : index
    %c0_14 = arith.constant 0 : index
    %c0_15 = arith.constant 0 : index
    %32 = vector.load %arg1[%c2, %c0_14, %c0_15] : memref<3x32x128xbf16, #tpu.memory_space<vmem>>, vector<1x32x128xbf16>
    %33 = vector.shape_cast %32 : vector<1x32x128xbf16> to vector<32x128xbf16>
    %cst_16 = arith.constant dense<0.000000e+00> : vector<16x128xf32>
    %34 = tpu.matmul %31, %33, %cst_16 {dimension_numbers = #tpu.dot_dimension_numbers<[1], [0], [0], [1], [0, 0, 1, 1], [], []>} : vector<16x32xbf16>, vector<32x128xbf16>, vector<16x128xf32> -> vector<16x128xf32>
    %35 = arith.addf %24, %34 : vector<16x128xf32>
    %c0_17 = arith.constant 0 : index
    %c0_18 = arith.constant 0 : index
    %36 = vector.load %arg2[%c0_17, %c0_18] : memref<1x128xf32, #tpu.memory_space<vmem>>, vector<1x128xf32>
    %37 = vector.broadcast %36 : vector<1x128xf32> to vector<16x128xf32>
    %38 = arith.addf %35, %37 : vector<16x128xf32>
    %cst_19 = arith.constant 0.000000e+00 : f32
    %39 = vector.broadcast %cst_19 : f32 to vector<16x128xf32>
    %40 = arith.maximumf %38, %39 : vector<16x128xf32>
    %41 = arith.truncf %40 : vector<16x128xf32> to vector<16x128xbf16>
    %c0_20 = arith.constant 0 : index
    %c0_21 = arith.constant 0 : index
    %42 = vector.load %arg3[%c0_20, %c0_21] : memref<128x256xbf16, #tpu.memory_space<vmem>>, vector<128x256xbf16>
    %cst_22 = arith.constant dense<0.000000e+00> : vector<16x256xf32>
    %43 = tpu.matmul %41, %42, %cst_22 {dimension_numbers = #tpu.dot_dimension_numbers<[1], [0], [0], [1], [0, 0, 1, 1], [], []>} : vector<16x128xbf16>, vector<128x256xbf16>, vector<16x256xf32> -> vector<16x256xf32>
    %c0_23 = arith.constant 0 : index
    %c0_24 = arith.constant 0 : index
    %44 = vector.load %arg4[%c0_23, %c0_24] : memref<1x256xf32, #tpu.memory_space<vmem>>, vector<1x256xf32>
    %45 = vector.broadcast %44 : vector<1x256xf32> to vector<16x256xf32>
    %46 = arith.addf %43, %45 : vector<16x256xf32>
    %c0_25 = arith.constant 0 : index
    %c0_26 = arith.constant 0 : index
    %47 = vector.load %arg5[%c0_25, %c0_26] : memref<64x256xbf16, #tpu.memory_space<vmem>>, vector<64x256xbf16>
    %48 = tpu.iota {dimensions = array<i32: 1>} : vector<2x256xi32>
    %c192_i32 = arith.constant 192 : i32
    %49 = vector.broadcast %c192_i32 : i32 to vector<2x256xi32>
    %50 = arith.cmpi slt, %48, %49 : vector<2x256xi32>
    %cst_27 = arith.constant 5.000000e-01 : f32
    %cst_28 = arith.constant 1.000000e+00 : f32
    %51 = vector.broadcast %cst_27 : f32 to vector<2x256xf32>
    %52 = vector.broadcast %cst_28 : f32 to vector<2x256xf32>
    %53 = arith.select %50, %51, %52 : vector<2x256xi1>, vector<2x256xf32>
    %cst_29 = arith.constant 5.000000e-01 : f32
    %cst_30 = arith.constant 1.000000e+00 : f32
    %54 = vector.broadcast %cst_29 : f32 to vector<2x256xf32>
    %55 = vector.broadcast %cst_30 : f32 to vector<2x256xf32>
    %56 = arith.select %50, %54, %55 : vector<2x256xi1>, vector<2x256xf32>
    %cst_31 = arith.constant 5.000000e-01 : f32
    %cst_32 = arith.constant 0.000000e+00 : f32
    %57 = vector.broadcast %cst_31 : f32 to vector<2x256xf32>
    %58 = vector.broadcast %cst_32 : f32 to vector<2x256xf32>
    %59 = arith.select %50, %57, %58 : vector<2x256xi1>, vector<2x256xf32>
    %cst_33 = arith.constant 0.000000e+00 : f32
    %60 = vector.broadcast %cst_33 : f32 to vector<2x64xf32>
    %cst_34 = arith.constant 0.000000e+00 : f32
    %61 = vector.broadcast %cst_34 : f32 to vector<2x64xf32>
    %62 = vector.extract_strided_slice %46 {offsets = [0, 0], sizes = [2, 256], strides = [1, 1]} : vector<16x256xf32> to vector<2x256xf32>
    %63 = arith.truncf %60 : vector<2x64xf32> to vector<2x64xbf16>
    %cst_35 = arith.constant dense<0.000000e+00> : vector<2x256xf32>
    %64 = tpu.matmul %63, %47, %cst_35 {dimension_numbers = #tpu.dot_dimension_numbers<[1], [0], [0], [1], [0, 0, 1, 1], [], []>} : vector<2x64xbf16>, vector<64x256xbf16>, vector<2x256xf32> -> vector<2x256xf32>
    %65 = arith.addf %64, %62 : vector<2x256xf32>
    %66 = arith.mulf %65, %53 : vector<2x256xf32>
    %67 = math.tanh %66 : vector<2x256xf32>
    %68 = arith.mulf %67, %56 : vector<2x256xf32>
    %69 = arith.addf %68, %59 : vector<2x256xf32>
    %70 = vector.extract_strided_slice %69 {offsets = [0, 0], sizes = [2, 64], strides = [1, 1]} : vector<2x256xf32> to vector<2x64xf32>
    %71 = vector.extract_strided_slice %69 {offsets = [0, 64], sizes = [2, 64], strides = [1, 1]} : vector<2x256xf32> to vector<2x64xf32>
    %72 = vector.extract_strided_slice %69 {offsets = [0, 128], sizes = [2, 64], strides = [1, 1]} : vector<2x256xf32> to vector<2x64xf32>
    %73 = vector.extract_strided_slice %69 {offsets = [0, 192], sizes = [2, 64], strides = [1, 1]} : vector<2x256xf32> to vector<2x64xf32>
    %74 = arith.mulf %71, %61 : vector<2x64xf32>
    %75 = arith.mulf %70, %73 : vector<2x64xf32>
    %76 = arith.addf %74, %75 : vector<2x64xf32>
    %77 = math.tanh %76 : vector<2x64xf32>
    %78 = arith.mulf %72, %77 : vector<2x64xf32>
    %79 = vector.extract_strided_slice %46 {offsets = [2, 0], sizes = [2, 256], strides = [1, 1]} : vector<16x256xf32> to vector<2x256xf32>
    %80 = arith.truncf %78 : vector<2x64xf32> to vector<2x64xbf16>
    %cst_36 = arith.constant dense<0.000000e+00> : vector<2x256xf32>
    %81 = tpu.matmul %80, %47, %cst_36 {dimension_numbers = #tpu.dot_dimension_numbers<[1], [0], [0], [1], [0, 0, 1, 1], [], []>} : vector<2x64xbf16>, vector<64x256xbf16>, vector<2x256xf32> -> vector<2x256xf32>
    %82 = arith.addf %81, %79 : vector<2x256xf32>
    %83 = arith.mulf %82, %53 : vector<2x256xf32>
    %84 = math.tanh %83 : vector<2x256xf32>
    %85 = arith.mulf %84, %56 : vector<2x256xf32>
    %86 = arith.addf %85, %59 : vector<2x256xf32>
    %87 = vector.extract_strided_slice %86 {offsets = [0, 0], sizes = [2, 64], strides = [1, 1]} : vector<2x256xf32> to vector<2x64xf32>
    %88 = vector.extract_strided_slice %86 {offsets = [0, 64], sizes = [2, 64], strides = [1, 1]} : vector<2x256xf32> to vector<2x64xf32>
    %89 = vector.extract_strided_slice %86 {offsets = [0, 128], sizes = [2, 64], strides = [1, 1]} : vector<2x256xf32> to vector<2x64xf32>
    %90 = vector.extract_strided_slice %86 {offsets = [0, 192], sizes = [2, 64], strides = [1, 1]} : vector<2x256xf32> to vector<2x64xf32>
    %91 = arith.mulf %88, %76 : vector<2x64xf32>
    %92 = arith.mulf %87, %90 : vector<2x64xf32>
    %93 = arith.addf %91, %92 : vector<2x64xf32>
    %94 = math.tanh %93 : vector<2x64xf32>
    %95 = arith.mulf %89, %94 : vector<2x64xf32>
    %96 = vector.extract_strided_slice %46 {offsets = [4, 0], sizes = [2, 256], strides = [1, 1]} : vector<16x256xf32> to vector<2x256xf32>
    %97 = arith.truncf %95 : vector<2x64xf32> to vector<2x64xbf16>
    %cst_37 = arith.constant dense<0.000000e+00> : vector<2x256xf32>
    %98 = tpu.matmul %97, %47, %cst_37 {dimension_numbers = #tpu.dot_dimension_numbers<[1], [0], [0], [1], [0, 0, 1, 1], [], []>} : vector<2x64xbf16>, vector<64x256xbf16>, vector<2x256xf32> -> vector<2x256xf32>
    %99 = arith.addf %98, %96 : vector<2x256xf32>
    %100 = arith.mulf %99, %53 : vector<2x256xf32>
    %101 = math.tanh %100 : vector<2x256xf32>
    %102 = arith.mulf %101, %56 : vector<2x256xf32>
    %103 = arith.addf %102, %59 : vector<2x256xf32>
    %104 = vector.extract_strided_slice %103 {offsets = [0, 0], sizes = [2, 64], strides = [1, 1]} : vector<2x256xf32> to vector<2x64xf32>
    %105 = vector.extract_strided_slice %103 {offsets = [0, 64], sizes = [2, 64], strides = [1, 1]} : vector<2x256xf32> to vector<2x64xf32>
    %106 = vector.extract_strided_slice %103 {offsets = [0, 128], sizes = [2, 64], strides = [1, 1]} : vector<2x256xf32> to vector<2x64xf32>
    %107 = vector.extract_strided_slice %103 {offsets = [0, 192], sizes = [2, 64], strides = [1, 1]} : vector<2x256xf32> to vector<2x64xf32>
    %108 = arith.mulf %105, %93 : vector<2x64xf32>
    %109 = arith.mulf %104, %107 : vector<2x64xf32>
    %110 = arith.addf %108, %109 : vector<2x64xf32>
    %111 = math.tanh %110 : vector<2x64xf32>
    %112 = arith.mulf %106, %111 : vector<2x64xf32>
    %113 = vector.extract_strided_slice %46 {offsets = [6, 0], sizes = [2, 256], strides = [1, 1]} : vector<16x256xf32> to vector<2x256xf32>
    %114 = arith.truncf %112 : vector<2x64xf32> to vector<2x64xbf16>
    %cst_38 = arith.constant dense<0.000000e+00> : vector<2x256xf32>
    %115 = tpu.matmul %114, %47, %cst_38 {dimension_numbers = #tpu.dot_dimension_numbers<[1], [0], [0], [1], [0, 0, 1, 1], [], []>} : vector<2x64xbf16>, vector<64x256xbf16>, vector<2x256xf32> -> vector<2x256xf32>
    %116 = arith.addf %115, %113 : vector<2x256xf32>
    %117 = arith.mulf %116, %53 : vector<2x256xf32>
    %118 = math.tanh %117 : vector<2x256xf32>
    %119 = arith.mulf %118, %56 : vector<2x256xf32>
    %120 = arith.addf %119, %59 : vector<2x256xf32>
    %121 = vector.extract_strided_slice %120 {offsets = [0, 0], sizes = [2, 64], strides = [1, 1]} : vector<2x256xf32> to vector<2x64xf32>
    %122 = vector.extract_strided_slice %120 {offsets = [0, 64], sizes = [2, 64], strides = [1, 1]} : vector<2x256xf32> to vector<2x64xf32>
    %123 = vector.extract_strided_slice %120 {offsets = [0, 128], sizes = [2, 64], strides = [1, 1]} : vector<2x256xf32> to vector<2x64xf32>
    %124 = vector.extract_strided_slice %120 {offsets = [0, 192], sizes = [2, 64], strides = [1, 1]} : vector<2x256xf32> to vector<2x64xf32>
    %125 = arith.mulf %122, %110 : vector<2x64xf32>
    %126 = arith.mulf %121, %124 : vector<2x64xf32>
    %127 = arith.addf %125, %126 : vector<2x64xf32>
    %128 = math.tanh %127 : vector<2x64xf32>
    %129 = arith.mulf %123, %128 : vector<2x64xf32>
    %130 = vector.extract_strided_slice %46 {offsets = [8, 0], sizes = [2, 256], strides = [1, 1]} : vector<16x256xf32> to vector<2x256xf32>
    %131 = arith.truncf %129 : vector<2x64xf32> to vector<2x64xbf16>
    %cst_39 = arith.constant dense<0.000000e+00> : vector<2x256xf32>
    %132 = tpu.matmul %131, %47, %cst_39 {dimension_numbers = #tpu.dot_dimension_numbers<[1], [0], [0], [1], [0, 0, 1, 1], [], []>} : vector<2x64xbf16>, vector<64x256xbf16>, vector<2x256xf32> -> vector<2x256xf32>
    %133 = arith.addf %132, %130 : vector<2x256xf32>
    %134 = arith.mulf %133, %53 : vector<2x256xf32>
    %135 = math.tanh %134 : vector<2x256xf32>
    %136 = arith.mulf %135, %56 : vector<2x256xf32>
    %137 = arith.addf %136, %59 : vector<2x256xf32>
    %138 = vector.extract_strided_slice %137 {offsets = [0, 0], sizes = [2, 64], strides = [1, 1]} : vector<2x256xf32> to vector<2x64xf32>
    %139 = vector.extract_strided_slice %137 {offsets = [0, 64], sizes = [2, 64], strides = [1, 1]} : vector<2x256xf32> to vector<2x64xf32>
    %140 = vector.extract_strided_slice %137 {offsets = [0, 128], sizes = [2, 64], strides = [1, 1]} : vector<2x256xf32> to vector<2x64xf32>
    %141 = vector.extract_strided_slice %137 {offsets = [0, 192], sizes = [2, 64], strides = [1, 1]} : vector<2x256xf32> to vector<2x64xf32>
    %142 = arith.mulf %139, %127 : vector<2x64xf32>
    %143 = arith.mulf %138, %141 : vector<2x64xf32>
    %144 = arith.addf %142, %143 : vector<2x64xf32>
    %145 = math.tanh %144 : vector<2x64xf32>
    %146 = arith.mulf %140, %145 : vector<2x64xf32>
    %147 = vector.extract_strided_slice %46 {offsets = [10, 0], sizes = [2, 256], strides = [1, 1]} : vector<16x256xf32> to vector<2x256xf32>
    %148 = arith.truncf %146 : vector<2x64xf32> to vector<2x64xbf16>
    %cst_40 = arith.constant dense<0.000000e+00> : vector<2x256xf32>
    %149 = tpu.matmul %148, %47, %cst_40 {dimension_numbers = #tpu.dot_dimension_numbers<[1], [0], [0], [1], [0, 0, 1, 1], [], []>} : vector<2x64xbf16>, vector<64x256xbf16>, vector<2x256xf32> -> vector<2x256xf32>
    %150 = arith.addf %149, %147 : vector<2x256xf32>
    %151 = arith.mulf %150, %53 : vector<2x256xf32>
    %152 = math.tanh %151 : vector<2x256xf32>
    %153 = arith.mulf %152, %56 : vector<2x256xf32>
    %154 = arith.addf %153, %59 : vector<2x256xf32>
    %155 = vector.extract_strided_slice %154 {offsets = [0, 0], sizes = [2, 64], strides = [1, 1]} : vector<2x256xf32> to vector<2x64xf32>
    %156 = vector.extract_strided_slice %154 {offsets = [0, 64], sizes = [2, 64], strides = [1, 1]} : vector<2x256xf32> to vector<2x64xf32>
    %157 = vector.extract_strided_slice %154 {offsets = [0, 128], sizes = [2, 64], strides = [1, 1]} : vector<2x256xf32> to vector<2x64xf32>
    %158 = vector.extract_strided_slice %154 {offsets = [0, 192], sizes = [2, 64], strides = [1, 1]} : vector<2x256xf32> to vector<2x64xf32>
    %159 = arith.mulf %156, %144 : vector<2x64xf32>
    %160 = arith.mulf %155, %158 : vector<2x64xf32>
    %161 = arith.addf %159, %160 : vector<2x64xf32>
    %162 = math.tanh %161 : vector<2x64xf32>
    %163 = arith.mulf %157, %162 : vector<2x64xf32>
    %164 = vector.extract_strided_slice %46 {offsets = [12, 0], sizes = [2, 256], strides = [1, 1]} : vector<16x256xf32> to vector<2x256xf32>
    %165 = arith.truncf %163 : vector<2x64xf32> to vector<2x64xbf16>
    %cst_41 = arith.constant dense<0.000000e+00> : vector<2x256xf32>
    %166 = tpu.matmul %165, %47, %cst_41 {dimension_numbers = #tpu.dot_dimension_numbers<[1], [0], [0], [1], [0, 0, 1, 1], [], []>} : vector<2x64xbf16>, vector<64x256xbf16>, vector<2x256xf32> -> vector<2x256xf32>
    %167 = arith.addf %166, %164 : vector<2x256xf32>
    %168 = arith.mulf %167, %53 : vector<2x256xf32>
    %169 = math.tanh %168 : vector<2x256xf32>
    %170 = arith.mulf %169, %56 : vector<2x256xf32>
    %171 = arith.addf %170, %59 : vector<2x256xf32>
    %172 = vector.extract_strided_slice %171 {offsets = [0, 0], sizes = [2, 64], strides = [1, 1]} : vector<2x256xf32> to vector<2x64xf32>
    %173 = vector.extract_strided_slice %171 {offsets = [0, 64], sizes = [2, 64], strides = [1, 1]} : vector<2x256xf32> to vector<2x64xf32>
    %174 = vector.extract_strided_slice %171 {offsets = [0, 128], sizes = [2, 64], strides = [1, 1]} : vector<2x256xf32> to vector<2x64xf32>
    %175 = vector.extract_strided_slice %171 {offsets = [0, 192], sizes = [2, 64], strides = [1, 1]} : vector<2x256xf32> to vector<2x64xf32>
    %176 = arith.mulf %173, %161 : vector<2x64xf32>
    %177 = arith.mulf %172, %175 : vector<2x64xf32>
    %178 = arith.addf %176, %177 : vector<2x64xf32>
    %179 = math.tanh %178 : vector<2x64xf32>
    %180 = arith.mulf %174, %179 : vector<2x64xf32>
    %181 = vector.extract_strided_slice %46 {offsets = [14, 0], sizes = [2, 256], strides = [1, 1]} : vector<16x256xf32> to vector<2x256xf32>
    %182 = arith.truncf %180 : vector<2x64xf32> to vector<2x64xbf16>
    %cst_42 = arith.constant dense<0.000000e+00> : vector<2x256xf32>
    %183 = tpu.matmul %182, %47, %cst_42 {dimension_numbers = #tpu.dot_dimension_numbers<[1], [0], [0], [1], [0, 0, 1, 1], [], []>} : vector<2x64xbf16>, vector<64x256xbf16>, vector<2x256xf32> -> vector<2x256xf32>
    %184 = arith.addf %183, %181 : vector<2x256xf32>
    %185 = arith.mulf %184, %53 : vector<2x256xf32>
    %186 = math.tanh %185 : vector<2x256xf32>
    %187 = arith.mulf %186, %56 : vector<2x256xf32>
    %188 = arith.addf %187, %59 : vector<2x256xf32>
    %189 = vector.extract_strided_slice %188 {offsets = [0, 0], sizes = [2, 64], strides = [1, 1]} : vector<2x256xf32> to vector<2x64xf32>
    %190 = vector.extract_strided_slice %188 {offsets = [0, 64], sizes = [2, 64], strides = [1, 1]} : vector<2x256xf32> to vector<2x64xf32>
    %191 = vector.extract_strided_slice %188 {offsets = [0, 128], sizes = [2, 64], strides = [1, 1]} : vector<2x256xf32> to vector<2x64xf32>
    %192 = vector.extract_strided_slice %188 {offsets = [0, 192], sizes = [2, 64], strides = [1, 1]} : vector<2x256xf32> to vector<2x64xf32>
    %193 = arith.mulf %190, %178 : vector<2x64xf32>
    %194 = arith.mulf %189, %192 : vector<2x64xf32>
    %195 = arith.addf %193, %194 : vector<2x64xf32>
    %196 = math.tanh %195 : vector<2x64xf32>
    %197 = arith.mulf %191, %196 : vector<2x64xf32>
    %198 = arith.truncf %197 : vector<2x64xf32> to vector<2x64xbf16>
    %c0_43 = arith.constant 0 : index
    %c0_44 = arith.constant 0 : index
    %199 = vector.load %arg6[%c0_43, %c0_44] : memref<64x128xbf16, #tpu.memory_space<vmem>>, vector<64x128xbf16>
    %cst_45 = arith.constant dense<0.000000e+00> : vector<2x128xf32>
    %200 = tpu.matmul %198, %199, %cst_45 {dimension_numbers = #tpu.dot_dimension_numbers<[1], [0], [0], [1], [0, 0, 1, 1], [], []>} : vector<2x64xbf16>, vector<64x128xbf16>, vector<2x128xf32> -> vector<2x128xf32>
    %c0_46 = arith.constant 0 : index
    %c0_47 = arith.constant 0 : index
    %201 = vector.load %arg7[%c0_46, %c0_47] : memref<1x128xf32, #tpu.memory_space<vmem>>, vector<1x128xf32>
    %202 = vector.broadcast %201 : vector<1x128xf32> to vector<2x128xf32>
    %203 = arith.addf %200, %202 : vector<2x128xf32>
    %c0_48 = arith.constant 0 : index
    %c0_49 = arith.constant 0 : index
    %204 = vector.load %arg8[%c0_48, %c0_49] : memref<2x128xf32, #tpu.memory_space<vmem>>, vector<2x128xf32>
    tpu.vector_store %arg8[%c0_48, %c0_49], %203 {strides = array<i32>} : memref<2x128xf32, #tpu.memory_space<vmem>>, vector<2x128xf32>,
    return
  }
}

</mosaic_0001>

<bundles_post_ra>
// kernel: cnn_lstm_forward.1
= control target key start
LH: loop header
LB: loop body
LE: loop exit
PB: predicated region body
PF: predicated region fallthrough
CT: control target
= control target key end

     0   :  { %13 = vsyncpa [#allocation3], 0  ;;  %s1817_s0 = inlined_call_operand.vmem [shape: s32[20,1], index: 0, kind: input, shape index: {}]   ;;  %s1818_s1 = inlined_call_operand.hbm [shape: bf16[3,32,128], index: 1, kind: input, shape index: {}]   ;;  %s1819_s2 = inlined_call_operand.vmem [shape: f32[1,128], index: 2, kind: input, shape index: {}]   ;;  %s1820_s3 = inlined_call_operand.hbm [shape: bf16[128,256], index: 3, kind: input, shape index: {}]   ;;  %s1821_s4 = inlined_call_operand.vmem [shape: f32[1,256], index: 4, kind: input, shape index: {}]   ;;  %s1822_s5 = inlined_call_operand.vmem [shape: bf16[64,256], index: 5, kind: input, shape index: {}]   ;;  %s1823_s6 = inlined_call_operand.hbm [shape: bf16[64,128], index: 6, kind: input, shape index: {}]   ;;  %s1824_s7 = inlined_call_operand.vmem [shape: f32[1,128], index: 7, kind: input, shape index: {}]   ;;  %s1825_s8 = inlined_call_operand.hbm [shape: f32[2,128], index: 8, kind: output, shape index: {}]  }
   0x1   :  { %14 = vsyncpa [#allocation6], 0 }
   0x2   :  { %15 = vsyncpa [#allocation4], 0  ;;  %s1486_s27 = smov [#allocation5]  }
   0x3   :  { %s37_s28 = sshll.u32 %s1486_s27, 4  ;;  %s38_s28 = int_to_ptr.vmem [resolvable:$true] %s37_s28 }
   0x4   :  { %s1408_s29 = scalar_lea.vmem %s38_s28, 2048  ;;  %p1413_p1 = scmp.lt.s32.totalorder %s38_s28, %s38_s28 }
   0x5   :  { %p1409_p0 = scmp.ne.s32.totalorder %s38_s28, %s1408_s29  ;;  %p1414_p2 = scmp.lt.s32.totalorder %s1408_s29, %s1408_s29 }
   0x7   :  { %p1415_p3 = por %p1414_p2, %p1413_p1 }
   0x9   :  { %p1416_p4 = pnand %p1415_p3, %p1409_p0 }
   0xb   :  { %1419 = shalt.err (!%p1416_p4)
}
   0xc   :  { %s1487_s30 = smov 128   ;;  %s1488_s9 = smov 8  }
   0xd   :  { %43 = dma.hbm_to_vmem [thread:$0]  %s1820_s3, 2048, %s38_s28, [#allocation6], %s1487_s30, %s1487_s30, %s1488_s9  }
   0xe   :  { %s1489_s12 = smov [#allocation2]  }
   0xf   :  { %s23_s13 = sshll.u32 %s1489_s12, 4  ;;  %s24_s13 = int_to_ptr.vmem [resolvable:$true] %s23_s13 }
  0x10   :  { %s1428_s14 = scalar_lea.vmem %s24_s13, 768  ;;  %p1433_p6 = scmp.lt.s32.totalorder %s24_s13, %s24_s13 }
  0x11   :  { %p1429_p5 = scmp.ne.s32.totalorder %s24_s13, %s1428_s14  ;;  %p1434_p7 = scmp.lt.s32.totalorder %s1428_s14, %s1428_s14 }
  0x13   :  { %p1435_p8 = por %p1434_p7, %p1433_p6 }
  0x15   :  { %p1436_p9 = pnand %p1435_p8, %p1429_p5 }
  0x17   :  { %1439 = shalt.err (!%p1436_p9)
}
  0x18   :  { %s1490_s15 = smov 64   ;;  %s1491_s16 = smov 4  }
  0x19   :  { %29 = dma.hbm_to_vmem [thread:$0]  %s1818_s1, 768, %s24_s13, [#allocation3], %s1490_s15, %s1490_s15, %s1491_s16  }
  0x1a   :  { %s1492_s19 = smov [#allocation7]  }
  0x1b   :  { %s53_s3 = sshll.u32 %s1492_s19, 4  ;;  %s54_s3 = int_to_ptr.vmem [resolvable:$true] %s53_s3 }
  0x1c   :  { %s1448_s20 = scalar_lea.vmem %s54_s3, 512  ;;  %p1453_p11 = scmp.lt.s32.totalorder %s54_s3, %s54_s3 }
  0x1d   :  { %p1449_p10 = scmp.ne.s32.totalorder %s54_s3, %s1448_s20  ;;  %p1454_p12 = scmp.lt.s32.totalorder %s1448_s20, %s1448_s20 }
  0x1f   :  { %p1455_p13 = por %p1454_p12, %p1453_p11 }
  0x21   :  { %p1456_p0 = pnand %p1455_p13, %p1449_p10 }
  0x23   :  { %1459 = shalt.err (!%p1456_p0)
}
  0x24   :  { %59 = dma.hbm_to_vmem [thread:$0]  %s1823_s6, 512, %s54_s3, [#allocation6], %s1490_s15, %s1490_s15, %s1491_s16  }
  0x25   :  { %1480 = dma.done.wait [#allocation3], 768  }
  0x26   :  { %1481 = vsyncadd [#allocation3], 4294966528 }
  0x27   :  { %1482 = dma.done.wait [#allocation6], 2560  }
  0x28   :  { %1483 = vsyncadd [#allocation6], 4294964736  ;;  %v1493_v0 = vmov 0   ;;  %v1494_v1 = vmov 0.0   ;;  %v72_v2 = vld [vmem:[%s1817_s0] sm:$0xff]  ;;  %v73_v4 = vld [vmem:[%s1817_s0 + $0x8] sm:$0xff]  ;;  %v75_v10 = vlaneseq }
  0x29   :  { %1304 = vset.pattern.permute.xlu0 %v1493_v0  ;;  %1305 = vset.pattern.permute.xlu1 %v1493_v0  ;;  %v74_v3 = vld [vmem:[%s1817_s0 + $0x10] sm:$0xf]  ;;  %v1306_v5 = vld [vmem:[#allocation2 + $0x8] sm:$0xff]   ;;  %v1307_v6 = vld [vmem:[#allocation2 + $0x18] sm:$0xff]   ;;  %vm1495_vm0 = vmmov 0   ;;  %vm121_vm4 = vcmask 261120  }
  0x2a   :  { %1264 = vmatprep.subr.bf16.mxu1 %v1494_v1  ;;  %1256 = vmatprep.subr.bf16.mxu0 %v1494_v1  ;;  %v1308_v7 = vld [vmem:[#allocation2] sm:$0xff]   ;;  %v1309_v8 = vld [vmem:[#allocation2 + $0x10] sm:$0xff]   ;;  %v1577_v11 = vand.u32 127, %v75_v10  ;;  %vm105_vm5 = vcmask 1046528   ;;  %v1310_v24 = vld [vmem:[#allocation2 + $0x28] sm:$0xff]   ;;  %vm227_vm6 = vcmask 1045504  }
  0x2b   :  { %78 = vperm.xlu0 %1304, %v72_v2   ;;  %93 = vperm.xlu1 %1305, %v74_v3   ;;  %v1314_v9 = vld [vmem:[#allocation5 + $0x74] ss:$8 sps:$4 sm:$0xff]   ;;  %v1312_v19 = vld [vmem:[#allocation5 + $0x70] ss:$8 sps:$4 sm:$0xff]   ;;  %v1317_v22 = vld [vmem:[#allocation5 + $0x64] ss:$8 sps:$4 sm:$0xff]  }
  0x2c   :  { %1265 = vmatpush3.bf16.msra.mxu1 %v1306_v5  ;;  %1257 = vmatpush3.bf16.msra.mxu0 %v1307_v6  ;;  %v1315_v25 = vld [vmem:[#allocation5 + $0x60] ss:$8 sps:$4 sm:$0xff]   ;;  %v1311_v27 = vld [vmem:[#allocation2 + $0x20] sm:$0xff]   ;;  %v1323_v33 = vld [vmem:[#allocation5 + $0x44] ss:$8 sps:$4 sm:$0xff]   ;;  %vm507_vm8 = vcmask 523264  }
  0x2d   :  { %1266 = vmatprep.subr.bf16.mxu1 %v1494_v1  ;;  %1258 = vmatprep.subr.bf16.mxu0 %v1494_v1  ;;  %v1320_v31 = vld [vmem:[#allocation5 + $0x54] ss:$8 sps:$4 sm:$0xff]   ;;  %v1318_v32 = vld [vmem:[#allocation5 + $0x50] ss:$8 sps:$4 sm:$0xff]   ;;  %v1596_v34 = vld [vmem:[%s1822_s5 + $0x34] ss:$8 sps:$4 sm:$0xff]  }
  0x2e   :  { %1268 = vmatprep.mubr.msk.bf16.mxu1 %vm1495_vm0, %v1494_v1  ;;  %1260 = vmatprep.mubr.msk.bf16.mxu0 %vm1495_vm0, %v1494_v1  ;;  %v1321_v35 = vld [vmem:[#allocation5 + $0x40] ss:$8 sps:$4 sm:$0xff]   ;;  %v1329_v37 = vld [vmem:[#allocation5 + $0x34] ss:$8 sps:$4 sm:$0xff]   ;;  %v1327_v39 = vld [vmem:[#allocation5 + $0x30] ss:$8 sps:$4 sm:$0xff]  }
  0x2f   :  { %81 = vperm.xlu0 %1304, %v73_v4   ;;  %v1601_v36 = vld [vmem:[%s1822_s5 + $0x30] ss:$8 sps:$4 sm:$0xff]   ;;  %v1608_v38 = vld [vmem:[%s1822_s5 + $0x24] ss:$8 sps:$4 sm:$0xff]   ;;  %v1613_v40 = vld [vmem:[%s1822_s5 + $0x20] ss:$8 sps:$4 sm:$0xff]  }
  0x30   :  { %1267 = vmatpush3.bf16.msra.mxu1 %v1308_v7  ;;  %1259 = vmatpush3.bf16.msra.mxu0 %v1309_v8  ;;  %v1335_v41 = vld [vmem:[#allocation5 + $0x24] ss:$8 sps:$4 sm:$0xff]   ;;  %v1333_v43 = vld [vmem:[#allocation5 + $0x20] ss:$8 sps:$4 sm:$0xff]   ;;  %v1341_v45 = vld [vmem:[#allocation5 + $0x14] ss:$8 sps:$4 sm:$0xff]  }
  0x31   :  { %1272 = vmatprep.subr.bf16.mxu0 %v1494_v1  ;;  %409 = vmatprep.subr.bf16.mxu1 %v1314_v9  ;;  %v1620_v42 = vld [vmem:[%s1822_s5 + $0x14] ss:$8 sps:$4 sm:$0xff]   ;;  %v1625_v44 = vld [vmem:[%s1822_s5 + $0x10] ss:$8 sps:$4 sm:$0xff]   ;;  %v1632_v46 = vld [vmem:[%s1822_s5 + $0x4] ss:$8 sps:$4 sm:$0xff]  }
  0x32   :  { %v1339_v47 = vld [vmem:[#allocation5 + $0x10] ss:$8 sps:$4 sm:$0xff]   ;;  %v1347_v49 = vld [vmem:[#allocation5 + $0x4] ss:$8 sps:$4 sm:$0xff]   ;;  %v1345_v50 = vld [vmem:[#allocation5] ss:$8 sps:$4 sm:$0xff]  }
  0x33   :  { %v1637_v48 = vld [vmem:[%s1822_s5] ss:$8 sps:$4 sm:$0xff]   ;;  %s1497_s1 = smov [#allocation8]  }
  0x34   :  { %v1204_v62 = vld [vmem:[%s1819_s2] ss:$0 sm:$0xff]  ;;  %s1185_s23 = sshll.u32 %s1497_s1, 4  ;;  %s1186_s23 = int_to_ptr.vmem [resolvable:$true] %s1185_s23 }
  0x35   :  { %s1460_s24 = scalar_lea.vmem %s1186_s23, 32  ;;  %p1465_p2 = scmp.lt.s32.totalorder %s1186_s23, %s1186_s23 }
  0x36   :  { %p1461_p1 = scmp.ne.s32.totalorder %s1186_s23, %s1460_s24  ;;  %p1466_p3 = scmp.lt.s32.totalorder %s1460_s24, %s1460_s24 }
  0x38   :  { %p1467_p4 = por %p1466_p3, %p1465_p2 }
  0x3a   :  { %p1468_p5 = pnand %p1467_p4, %p1461_p1 }
  0xa6   :  { %v79_v12 = vpop.permute.xlu0 %78  ;;  %v94_v13 = vpop.permute.xlu1 %93 }
  0xa7   :  { %vm95_vm1 = vcmp.eq.s32.totalorder %v94_v13, %v1577_v11  ;;  %vm83_vm2 = vcmp.eq.s32.totalorder %v79_v12, %v1577_v11 }
  0xa8   :  { %v96_v14 = vsel %vm95_vm1, 1.0, %v1494_v1  ;;  %v85_v17 = vsel %vm83_vm2, 1.0, %v1494_v1 }
  0xa9   :  { %v97_v15 = vpack.c.bf16 %v96_v14, %v96_v14 }
  0xaa   :  { %v82_v16 = vpop.permute.xlu0 %81 }
  0xab   :  { %vm84_vm3 = vcmp.eq.s32.totalorder %v82_v16, %v1577_v11  ;;  %v107_v20 = vrot.slane %v97_v15, 1  ;;  %v229_v28 = vrot.slane %v97_v15, 2 }
  0xac   :  { %v86_v18 = vsel %vm84_vm3, 1.0, %v1494_v1 }
  0xad   :  { %v87_v21 = vpack.c.bf16 %v86_v18, %v85_v17  ;;  %v320_v17 = vshrl.u32 %v75_v10, 7 }
  0xaf   :  { %v106_v23 = vrot.slane %v87_v21, 1  ;;  %1269 = vmatmul.mubr.msk.bf16.vlgmr.msra.gmra.mxu1 %vm121_vm4, %v87_v21  ;;  %v228_v29 = vrot.slane %v87_v21, 2  ;;  %v325_v18 = vsub.s32 1, %v320_v17  ;;  %v321_v21 = vsub.s32 0, %v320_v17 }
  0xb0   :  { %410 = vmatpush1.bf16.msra.mxu1 %v1312_v19  ;;  %441 = vmatprep.mubr.bf16.mxu1 %v1493_v0  ;;  %v460_v19 = vadd.s32 128, %v1577_v11 }
  0xb1   :  { %v108_v26 = vsel %vm105_vm5, %v106_v23, %v107_v20  ;;  %411 = vmatprep.subr.bf16.mxu1 %v1317_v22  ;;  %v230_v30 = vsel %vm227_vm6, %v228_v29, %v229_v28  ;;  %v317_v20 = vld [vmem:[%s1821_s4] sm:$0x3] }
  0xb2   :  { %1261 = vmatmul.mubr.msk.bf16.vlgmr.msra.gmra.mxu0 %vm121_vm4, %v108_v26  ;;  %v1670_v22 = vrot.slane %v317_v20, %v325_v18  ;;  %vm462_vm7 = vcmp.lt.s32.totalorder %v460_v19, 192 }
  0xb3   :  { %1273 = vmatpush3.bf16.msra.mxu0 %v1310_v24  ;;  %1276 = vmatprep.mubr.msk.bf16.mxu0 %vm1495_vm0, %v1494_v1 }
  0xb4   :  { %1274 = vmatprep.subr.bf16.mxu0 %v1494_v1  ;;  %412 = vmatpush1.bf16.msra.mxu1 %v1315_v25  ;;  %v322_v25 = vrot.slane %v317_v20, %v321_v21 }
  0xb5   :  { %413 = vmatprep.subr.bf16.mxu1 %v1320_v31 }
  0xb7   :  { %1275 = vmatpush3.bf16.msra.mxu0 %v1311_v27  ;;  %v1496_v27 = vmov 1.0  }
  0xb8   :  { %414 = vmatpush1.bf16.msra.mxu1 %v1318_v32  ;;  %519 = vmatprep.subr.bf16.mxu0 %v1596_v34  ;;  %v1675_v28 = vsel %vm462_vm7, 0.5, %v1496_v27  ;;  %v1682_v32 = vsel %vm462_vm7, 0.5, %v1494_v1 }
  0xb9   :  { %415 = vmatprep.subr.bf16.mxu1 %v1323_v33 }
  0xba   :  { %1277 = vmatmul.mubr.msk.bf16.vlgmr.msra.gmra.mxu0 %vm121_vm4, %v230_v30 }
  0xbb   :  { %543 = vmatprep.mubr.bf16.mxu0 %v1493_v0  ;;  %520 = vmatpush1.bf16.msra.mxu0 %v1601_v36 }
  0xbc   :  { %416 = vmatpush1.bf16.msra.mxu1 %v1321_v35  ;;  %521 = vmatprep.subr.bf16.mxu0 %v1608_v38 }
  0xbd   :  { %417 = vmatprep.subr.bf16.mxu1 %v1329_v37 }
  0xbf   :  { %522 = vmatpush1.bf16.msra.mxu0 %v1613_v40 }
  0xc0   :  { %418 = vmatpush1.bf16.msra.mxu1 %v1327_v39  ;;  %523 = vmatprep.subr.bf16.mxu0 %v1620_v42 }
  0xc1   :  { %419 = vmatprep.subr.bf16.mxu1 %v1335_v41 }
  0xc3   :  { %524 = vmatpush1.bf16.msra.mxu0 %v1625_v44 }
  0xc4   :  { %420 = vmatpush1.bf16.msra.mxu1 %v1333_v43  ;;  %525 = vmatprep.subr.bf16.mxu0 %v1632_v46 }
  0xc5   :  { %421 = vmatprep.subr.bf16.mxu1 %v1341_v45 }
  0xc7   :  { %526 = vmatpush1.bf16.msra.mxu0 %v1637_v48 }
  0xc8   :  { %422 = vmatpush1.bf16.msra.mxu1 %v1339_v47  ;;  %595 = vmatprep.subr.bf16.mxu0 %v1596_v34 }
  0xc9   :  { %423 = vmatprep.subr.bf16.mxu1 %v1347_v49 }
  0xca   :  { %544 = vmatmul.mubr.bf16.vlgmr.msra.gmra.mxu0 %v1493_v0 }
  0xcb   :  { %596 = vmatpush1.bf16.msra.mxu0 %v1601_v36  ;;  %619 = vmatprep.mubr.bf16.mxu0 %v1493_v0 }
  0xcc   :  { %424 = vmatpush1.bf16.msra.mxu1 %v1345_v50  ;;  %597 = vmatprep.subr.bf16.mxu0 %v1608_v38 }
  0xcd   :  { %669 = vmatprep.subr.bf16.mxu1 %v1596_v34 }
  0xcf   :  { %598 = vmatpush1.bf16.msra.mxu0 %v1613_v40 }
  0xd0   :  { %599 = vmatprep.subr.bf16.mxu0 %v1620_v42 }
  0xd3   :  { %600 = vmatpush1.bf16.msra.mxu0 %v1625_v44 }
  0xd4   :  { %601 = vmatprep.subr.bf16.mxu0 %v1632_v46 }
  0xd7   :  { %602 = vmatpush1.bf16.msra.mxu0 %v1637_v48 }
  0xd8   :  { %743 = vmatprep.subr.bf16.mxu0 %v1596_v34 }
 0x16f   :  { %v215_v51 = vpop.f32.mrf.mxu1 }
 0x171   :  { %v1270_v52 = vpop.f32.mrf.mxu1 }
 0x172   :  { %v159_v53 = vpop.f32.mrf.mxu0 }
 0x173   :  { %v218_v54 = vpop.f32.mrf.mxu1  ;;  %v216_v59 = vadd.f32 %v215_v51, %v159_v53 }
 0x174   :  { %v1262_v55 = vpop.f32.mrf.mxu0 }
 0x175   :  { %v1271_v56 = vpop.f32.mrf.mxu1 }
 0x176   :  { %v162_v57 = vpop.f32.mrf.mxu0 }
 0x177   :  { %v219_v2 = vadd.f32 %v218_v54, %v162_v57 }
 0x178   :  { %v1263_v58 = vpop.f32.mrf.mxu0 }
 0x17a   :  { %v280_v60 = vpop.f32.mrf.mxu0 }
 0x17b   :  { %v287_v61 = vadd.f32 %v280_v60, %v216_v59 }
 0x17c   :  { %v1278_v63 = vpop.f32.mrf.mxu0 }
 0x17d   :  { %v296_v4 = vadd.f32 %v1204_v62, %v287_v61 }
 0x17e   :  { %v283_v3 = vpop.f32.mrf.mxu0 }
 0x17f   :  { %v288_v5 = vadd.f32 %v283_v3, %v219_v2  ;;  %v298_v8 = vmax.f32 %v296_v4, 0.0 }
 0x180   :  { %v1279_v6 = vpop.f32.mrf.mxu0 }
 0x181   :  { %v297_v7 = vadd.f32 %v1204_v62, %v288_v5 }
 0x183   :  { %v299_v9 = vmax.f32 %v297_v7, 0.0 }
 0x185   :  { %v300_v12 = vpack.c.bf16 %v299_v9, %v298_v8 }
 0x187   :  { %442 = vmatmul.mubr.bf16.vlgmr.msra.gmra.mxu1 %v300_v12 }
 0x188   :  { %670 = vmatpush1.bf16.msra.mxu1 %v1601_v36  ;;  %693 = vmatprep.mubr.bf16.mxu1 %v1493_v0 }
 0x189   :  { %671 = vmatprep.subr.bf16.mxu1 %v1608_v38 }
 0x18a   :  { %v545_v13 = vpop.f32.mrf.mxu0 }
 0x18c   :  { %672 = vmatpush1.bf16.msra.mxu1 %v1613_v40  ;;  %v547_v14 = vpop.f32.mrf.mxu0 }
 0x18d   :  { %673 = vmatprep.subr.bf16.mxu1 %v1620_v42 }
 0x18e   :  { %v549_v15 = vpop.f32.mrf.mxu0 }
 0x190   :  { %674 = vmatpush1.bf16.msra.mxu1 %v1625_v44  ;;  %v550_v16 = vpop.f32.mrf.mxu0 }
 0x191   :  { %675 = vmatprep.subr.bf16.mxu1 %v1632_v46 }
 0x194   :  { %676 = vmatpush1.bf16.msra.mxu1 %v1637_v48 }
 0x195   :  { %813 = vmatprep.subr.bf16.mxu1 %v1596_v34 }
 0x247   :  { %v443_v23 = vpop.f32.mrf.mxu1 }
 0x248   :  { %v1687_v37 = vadd.f32 %v443_v23, %v322_v25 }
 0x249   :  { %v445_v24 = vpop.f32.mrf.mxu1 }
 0x24a   :  { %v1673_v26 = vadd.f32 %v445_v24, %v1670_v22  ;;  %v546_v39 = vadd.f32 %v545_v13, %v1687_v37  ;;  %v580_v58 = vrot.slane %v1687_v37, 2 }
 0x24b   :  { %v447_v10 = vpop.f32.mrf.mxu1 }
 0x24c   :  { %v548_v11 = vadd.f32 %v547_v14, %v1673_v26  ;;  %v1678_v29 = vadd.f32 %v447_v10, %v322_v25  ;;  %v552_v41 = vmul.f32 0.5, %v546_v39  ;;  %v581_v61 = vrot.slane %v1673_v26, 2 }
 0x24d   :  { %v1720_v24 = vpop.f32.mrf.mxu1  ;;  %v654_v25 = vrot.slane %v1687_v37, 4 }
 0x24e   :  { %v553_v30 = vmul.f32 %v548_v11, %v1675_v28  ;;  %v655_v11 = vrot.slane %v1673_v26, 4 }
 0x250   :  { %1352 = vtanh.f32 %v553_v30 }
 0x251   :  { %1354 = vtanh.f32 %v552_v41 }
 0x25d   :  { %v1353_v31 = vpop.eup %1352 }
 0x25e   :  { %v557_v33 = vmul.f32 %v1353_v31, %v1675_v28  ;;  %v1355_v43 = vpop.eup %1354 }
 0x25f   :  { %v556_v45 = vmul.f32 0.5, %v1355_v43 }
 0x260   :  { %v559_v35 = vadd.f32 %v557_v33, %v1682_v32 }
 0x261   :  { %v558_v47 = vadd.f32 0.5, %v556_v45 }
 0x262   :  { %562 = vrot.lane.b32.xlu1 %v559_v35, %s1490_s15 }
 0x263   :  { %v560_v51 = vmul.f32 0.0, %v558_v47 }
 0x2d4   :  { %v563_v49 = vpop.permute.xlu1 %562 }
 0x2d5   :  { %v565_v50 = vmul.f32 %v563_v49, %v558_v47 }
 0x2d7   :  { %567 = vrot.lane.b32.xlu0 %v565_v50, %s1490_s15 }
 0x349   :  { %v568_v52 = vpop.permute.xlu0 %567 }
 0x34a   :  { %v570_v53 = vadd.f32 %v568_v52, %v560_v51 }
 0x34c   :  { %1356 = vtanh.f32 %v570_v53 }
 0x359   :  { %v1357_v54 = vpop.eup %1356 }
 0x35a   :  { %573 = vrot.lane.b32.xlu1 %v1357_v54, %s1490_s15 }
 0x3cc   :  { %v574_v55 = vpop.permute.xlu1 %573 }
 0x3cd   :  { %v576_v56 = vmul.f32 %v574_v55, %v559_v35 }
 0x3cf   :  { %v577_v57 = vpack.c.bf16 %v576_v56, %v576_v56 }
 0x3d1   :  { %1229 = vmatmul.mubr.msk.bf16.vlgmr.msra.gmra.mxu0 %vm507_vm8, %v577_v57 }
 0x3d2   :  { %744 = vmatpush1.bf16.msra.mxu0 %v1601_v36  ;;  %767 = vmatprep.mubr.bf16.mxu0 %v1493_v0 }
 0x3d3   :  { %745 = vmatprep.subr.bf16.mxu0 %v1608_v38 }
 0x3d6   :  { %746 = vmatpush1.bf16.msra.mxu0 %v1613_v40 }
 0x3d7   :  { %747 = vmatprep.subr.bf16.mxu0 %v1620_v42 }
 0x3da   :  { %748 = vmatpush1.bf16.msra.mxu0 %v1625_v44 }
 0x3db   :  { %749 = vmatprep.subr.bf16.mxu0 %v1632_v46 }
 0x3de   :  { %750 = vmatpush1.bf16.msra.mxu0 %v1637_v48 }
 0x3df   :  { %889 = vmatprep.subr.bf16.mxu0 %v1596_v34 }
 0x491   :  { %v621_v59 = vpop.f32.mrf.mxu0 }
 0x492   :  { %v622_v60 = vadd.f32 %v621_v59, %v580_v58 }
 0x493   :  { %v623_v62 = vpop.f32.mrf.mxu0 }
 0x494   :  { %v624_v63 = vadd.f32 %v623_v62, %v581_v61  ;;  %v628_v8 = vmul.f32 0.5, %v622_v60  ;;  %v728_v61 = vrot.slane %v1687_v37, 6 }
 0x495   :  { %v625_v2 = vpop.f32.mrf.mxu0 }
 0x496   :  { %v629_v3 = vmul.f32 %v624_v63, %v1675_v28  ;;  %v729_v2 = vrot.slane %v1673_v26, 6 }
 0x497   :  { %v626_v4 = vpop.f32.mrf.mxu0 }
 0x498   :  { %1358 = vtanh.f32 %v629_v3 }
 0x499   :  { %1360 = vtanh.f32 %v628_v8 }
 0x4a5   :  { %v1359_v5 = vpop.eup %1358 }
 0x4a6   :  { %v633_v6 = vmul.f32 %v1359_v5, %v1675_v28  ;;  %v1361_v9 = vpop.eup %1360 }
 0x4a7   :  { %v632_v12 = vmul.f32 0.5, %v1361_v9 }
 0x4a8   :  { %v635_v7 = vadd.f32 %v633_v6, %v1682_v32 }
 0x4a9   :  { %v634_v13 = vadd.f32 0.5, %v632_v12 }
 0x4aa   :  { %638 = vrot.lane.b32.xlu0 %v635_v7, %s1490_s15 }
 0x4ab   :  { %v636_v16 = vmul.f32 %v634_v13, %v570_v53 }
 0x51c   :  { %v639_v14 = vpop.permute.xlu0 %638 }
 0x51d   :  { %v641_v15 = vmul.f32 %v639_v14, %v634_v13 }
 0x51f   :  { %643 = vrot.lane.b32.xlu1 %v641_v15, %s1490_s15 }
 0x591   :  { %v644_v17 = vpop.permute.xlu1 %643 }
 0x592   :  { %v646_v18 = vadd.f32 %v644_v17, %v636_v16 }
 0x594   :  { %1362 = vtanh.f32 %v646_v18 }
 0x5a1   :  { %v1363_v19 = vpop.eup %1362 }
 0x5a2   :  { %649 = vrot.lane.b32.xlu0 %v1363_v19, %s1490_s15 }
 0x614   :  { %v650_v20 = vpop.permute.xlu0 %649 }
 0x615   :  { %v652_v21 = vmul.f32 %v650_v20, %v635_v7 }
 0x617   :  { %v653_v23 = vpack.c.bf16 %v652_v21, %v652_v21 }
 0x619   :  { %1230 = vmatmul.mubr.msk.bf16.vlgmr.msra.gmra.mxu1 %vm507_vm8, %v653_v23 }
 0x61a   :  { %814 = vmatpush1.bf16.msra.mxu1 %v1601_v36  ;;  %837 = vmatprep.mubr.bf16.mxu1 %v1493_v0 }
 0x61b   :  { %815 = vmatprep.subr.bf16.mxu1 %v1608_v38 }
 0x61e   :  { %816 = vmatpush1.bf16.msra.mxu1 %v1613_v40 }
 0x61f   :  { %817 = vmatprep.subr.bf16.mxu1 %v1620_v42 }
 0x622   :  { %818 = vmatpush1.bf16.msra.mxu1 %v1625_v44 }
 0x623   :  { %819 = vmatprep.subr.bf16.mxu1 %v1632_v46 }
 0x626   :  { %820 = vmatpush1.bf16.msra.mxu1 %v1637_v48 }
 0x627   :  { %963 = vmatprep.subr.bf16.mxu1 %v1596_v34 }
 0x6d9   :  { %v695_v27 = vpop.f32.mrf.mxu1 }
 0x6da   :  { %v696_v10 = vadd.f32 %v695_v27, %v654_v25  ;;  %v1760_v27 = vadd.f32 %v1720_v24, %v1670_v22 }
 0x6db   :  { %v697_v30 = vpop.f32.mrf.mxu1 }
 0x6dc   :  { %v698_v31 = vadd.f32 %v697_v30, %v655_v11  ;;  %v702_v47 = vmul.f32 0.5, %v696_v10 }
 0x6dd   :  { %v699_v33 = vpop.f32.mrf.mxu1 }
 0x6de   :  { %v703_v35 = vmul.f32 %v698_v31, %v1675_v28 }
 0x6df   :  { %v700_v39 = vpop.f32.mrf.mxu1 }
 0x6e0   :  { %1364 = vtanh.f32 %v703_v35 }
 0x6e1   :  { %1366 = vtanh.f32 %v702_v47 }
 0x6ed   :  { %v1365_v41 = vpop.eup %1364 }
 0x6ee   :  { %v707_v43 = vmul.f32 %v1365_v41, %v1675_v28  ;;  %v1367_v49 = vpop.eup %1366 }
 0x6ef   :  { %v706_v50 = vmul.f32 0.5, %v1367_v49 }
 0x6f0   :  { %v709_v45 = vadd.f32 %v707_v43, %v1682_v32 }
 0x6f1   :  { %v708_v51 = vadd.f32 0.5, %v706_v50 }
 0x6f2   :  { %712 = vrot.lane.b32.xlu1 %v709_v45, %s1490_s15 }
 0x6f3   :  { %v710_v54 = vmul.f32 %v708_v51, %v646_v18 }
 0x764   :  { %v713_v52 = vpop.permute.xlu1 %712 }
 0x765   :  { %v715_v53 = vmul.f32 %v713_v52, %v708_v51 }
 0x767   :  { %717 = vrot.lane.b32.xlu0 %v715_v53, %s1490_s15 }
 0x7d9   :  { %v718_v55 = vpop.permute.xlu0 %717 }
 0x7da   :  { %v720_v56 = vadd.f32 %v718_v55, %v710_v54 }
 0x7dc   :  { %1368 = vtanh.f32 %v720_v56 }
 0x7e9   :  { %v1369_v57 = vpop.eup %1368 }
 0x7ea   :  { %723 = vrot.lane.b32.xlu1 %v1369_v57, %s1490_s15 }
 0x85c   :  { %v724_v58 = vpop.permute.xlu1 %723 }
 0x85d   :  { %v726_v59 = vmul.f32 %v724_v58, %v709_v45 }
 0x85f   :  { %v727_v60 = vpack.c.bf16 %v726_v59, %v726_v59  ;;  %v875_v59 = vrot.slane %v1760_v27, 2 }
 0x861   :  { %1231 = vmatmul.mubr.msk.bf16.vlgmr.msra.gmra.mxu0 %vm507_vm8, %v727_v60 }
 0x862   :  { %890 = vmatpush1.bf16.msra.mxu0 %v1601_v36  ;;  %913 = vmatprep.mubr.bf16.mxu0 %v1493_v0 }
 0x863   :  { %891 = vmatprep.subr.bf16.mxu0 %v1608_v38 }
 0x866   :  { %892 = vmatpush1.bf16.msra.mxu0 %v1613_v40 }
 0x867   :  { %893 = vmatprep.subr.bf16.mxu0 %v1620_v42 }
 0x86a   :  { %894 = vmatpush1.bf16.msra.mxu0 %v1625_v44 }
 0x86b   :  { %895 = vmatprep.subr.bf16.mxu0 %v1632_v46 }
 0x86e   :  { %896 = vmatpush1.bf16.msra.mxu0 %v1637_v48 }
 0x86f   :  { %1037 = vmatprep.subr.bf16.mxu0 %v1596_v34 }
 0x921   :  { %v769_v62 = vpop.f32.mrf.mxu0 }
 0x922   :  { %v770_v63 = vadd.f32 %v769_v62, %v728_v61 }
 0x923   :  { %v771_v3 = vpop.f32.mrf.mxu0 }
 0x924   :  { %v772_v4 = vadd.f32 %v771_v3, %v729_v2  ;;  %v776_v34 = vmul.f32 0.5, %v770_v63 }
 0x925   :  { %v773_v5 = vpop.f32.mrf.mxu0 }
 0x926   :  { %v777_v6 = vmul.f32 %v772_v4, %v1675_v28 }
 0x927   :  { %v774_v7 = vpop.f32.mrf.mxu0 }
 0x928   :  { %1370 = vtanh.f32 %v777_v6 }
 0x929   :  { %1372 = vtanh.f32 %v776_v34 }
 0x935   :  { %v1371_v8 = vpop.eup %1370 }
 0x936   :  { %v781_v9 = vmul.f32 %v1371_v8, %v1675_v28  ;;  %v1373_v37 = vpop.eup %1372 }
 0x937   :  { %v780_v13 = vmul.f32 0.5, %v1373_v37 }
 0x938   :  { %v783_v12 = vadd.f32 %v781_v9, %v1682_v32 }
 0x939   :  { %v782_v14 = vadd.f32 0.5, %v780_v13 }
 0x93a   :  { %786 = vrot.lane.b32.xlu0 %v783_v12, %s1490_s15 }
 0x93b   :  { %v784_v16 = vmul.f32 %v782_v14, %v720_v56 }
 0x9ac   :  { %v787_v26 = vpop.permute.xlu0 %786 }
 0x9ad   :  { %v789_v15 = vmul.f32 %v787_v26, %v782_v14  ;;  %v949_v14 = vrot.slane %v1760_v27, 4 }
 0x9af   :  { %791 = vrot.lane.b32.xlu1 %v789_v15, %s1490_s15 }
 0xa21   :  { %v792_v17 = vpop.permute.xlu1 %791 }
 0xa22   :  { %v794_v18 = vadd.f32 %v792_v17, %v784_v16 }
 0xa24   :  { %1374 = vtanh.f32 %v794_v18 }
 0xa31   :  { %v1375_v19 = vpop.eup %1374 }
 0xa32   :  { %797 = vrot.lane.b32.xlu0 %v1375_v19, %s1490_s15 }
 0xaa4   :  { %v798_v20 = vpop.permute.xlu0 %797 }
 0xaa5   :  { %v800_v21 = vmul.f32 %v798_v20, %v783_v12 }
 0xaa7   :  { %v801_v23 = vpack.c.bf16 %v800_v21, %v800_v21 }
 0xaa9   :  { %1232 = vmatmul.mubr.msk.bf16.vlgmr.msra.gmra.mxu1 %vm507_vm8, %v801_v23  ;;  %v948_v23 = vrot.slane %v1678_v29, 4 }
 0xaaa   :  { %964 = vmatpush1.bf16.msra.mxu1 %v1601_v36  ;;  %987 = vmatprep.mubr.bf16.mxu1 %v1493_v0 }
 0xaab   :  { %965 = vmatprep.subr.bf16.mxu1 %v1608_v38 }
 0xaae   :  { %966 = vmatpush1.bf16.msra.mxu1 %v1613_v40 }
 0xaaf   :  { %967 = vmatprep.subr.bf16.mxu1 %v1620_v42 }
 0xab2   :  { %968 = vmatpush1.bf16.msra.mxu1 %v1625_v44 }
 0xab3   :  { %969 = vmatprep.subr.bf16.mxu1 %v1632_v46 }
 0xab6   :  { %970 = vmatpush1.bf16.msra.mxu1 %v1637_v48 }
 0xab7   :  { %1280 = vmatprep.subr.bf16.mxu1 %v1494_v1 }
 0xb69   :  { %v839_v25 = vpop.f32.mrf.mxu1 }
 0xb6a   :  { %v840_v43 = vadd.f32 %v839_v25, %v1678_v29 }
 0xb6b   :  { %v841_v10 = vpop.f32.mrf.mxu1 }
 0xb6c   :  { %v842_v11 = vadd.f32 %v841_v10, %v1760_v27  ;;  %v846_v45 = vmul.f32 0.5, %v840_v43 }
 0xb6d   :  { %v843_v30 = vpop.f32.mrf.mxu1 }
 0xb6e   :  { %v847_v31 = vmul.f32 %v842_v11, %v1675_v28 }
 0xb6f   :  { %v844_v33 = vpop.f32.mrf.mxu1 }
 0xb70   :  { %1376 = vtanh.f32 %v847_v31 }
 0xb71   :  { %1378 = vtanh.f32 %v846_v45 }
 0xb7d   :  { %v1377_v35 = vpop.eup %1376 }
 0xb7e   :  { %v851_v39 = vmul.f32 %v1377_v35, %v1675_v28  ;;  %v1379_v22 = vpop.eup %1378 }
 0xb7f   :  { %v850_v24 = vmul.f32 0.5, %v1379_v22 }
 0xb80   :  { %v853_v41 = vadd.f32 %v851_v39, %v1682_v32 }
 0xb81   :  { %v852_v47 = vadd.f32 0.5, %v850_v24 }
 0xb82   :  { %856 = vrot.lane.b32.xlu1 %v853_v41, %s1490_s15 }
 0xb83   :  { %v854_v51 = vmul.f32 %v852_v47, %v794_v18 }
 0xbf4   :  { %v857_v49 = vpop.permute.xlu1 %856 }
 0xbf5   :  { %v859_v50 = vmul.f32 %v857_v49, %v852_v47 }
 0xbf7   :  { %861 = vrot.lane.b32.xlu0 %v859_v50, %s1490_s15  ;;  %v1023_v50 = vrot.slane %v1760_v27, 6 }
 0xc69   :  { %v862_v52 = vpop.permute.xlu0 %861 }
 0xc6a   :  { %v864_v53 = vadd.f32 %v862_v52, %v854_v51 }
 0xc6c   :  { %1380 = vtanh.f32 %v864_v53 }
 0xc79   :  { %v1381_v54 = vpop.eup %1380 }
 0xc7a   :  { %867 = vrot.lane.b32.xlu1 %v1381_v54, %s1490_s15 }
 0xcec   :  { %v868_v55 = vpop.permute.xlu1 %867 }
 0xced   :  { %v870_v56 = vmul.f32 %v868_v55, %v853_v41 }
 0xcef   :  { %v871_v57 = vpack.c.bf16 %v870_v56, %v870_v56 }
 0xcf1   :  { %1233 = vmatmul.mubr.msk.bf16.vlgmr.msra.gmra.mxu0 %vm507_vm8, %v871_v57 }
 0xcf2   :  { %1038 = vmatpush1.bf16.msra.mxu0 %v1601_v36  ;;  %1061 = vmatprep.mubr.bf16.mxu0 %v1493_v0 }
 0xcf3   :  { %1039 = vmatprep.subr.bf16.mxu0 %v1608_v38 }
 0xcf6   :  { %1040 = vmatpush1.bf16.msra.mxu0 %v1613_v40 }
 0xcf7   :  { %1041 = vmatprep.subr.bf16.mxu0 %v1620_v42 }
 0xcfa   :  { %1042 = vmatpush1.bf16.msra.mxu0 %v1625_v44  ;;  %v874_v44 = vrot.slane %v1678_v29, 2 }
 0xcfb   :  { %1043 = vmatprep.subr.bf16.mxu0 %v1632_v46 }
 0xcfe   :  { %1044 = vmatpush1.bf16.msra.mxu0 %v1637_v48 }
 0xdb1   :  { %v915_v58 = vpop.f32.mrf.mxu0 }
 0xdb2   :  { %v916_v46 = vadd.f32 %v915_v58, %v874_v44 }
 0xdb3   :  { %v917_v60 = vpop.f32.mrf.mxu0 }
 0xdb4   :  { %v918_v61 = vadd.f32 %v917_v60, %v875_v59  ;;  %v922_v48 = vmul.f32 0.5, %v916_v46  ;;  %v1022_v59 = vrot.slane %v1678_v29, 6  ;;  %v1351_v46 = vld [vmem:[#allocation7] sm:$0xff]  }
 0xdb5   :  { %v919_v36 = vpop.f32.mrf.mxu0 }
 0xdb6   :  { %v923_v0 = vmul.f32 %v918_v61, %v1675_v28 }
 0xdb7   :  { %v920_v62 = vpop.f32.mrf.mxu0 }
 0xdb8   :  { %1382 = vtanh.f32 %v923_v0 }
 0xdb9   :  { %1384 = vtanh.f32 %v922_v48 }
 0xdc5   :  { %v1383_v38 = vpop.eup %1382 }
 0xdc6   :  { %v927_v40 = vmul.f32 %v1383_v38, %v1675_v28  ;;  %v1385_v63 = vpop.eup %1384 }
 0xdc7   :  { %v926_v2 = vmul.f32 0.5, %v1385_v63 }
 0xdc8   :  { %v929_v42 = vadd.f32 %v927_v40, %v1682_v32  ;;  %v1348_v40 = vld [vmem:[#allocation7 + $0x18] sm:$0xff]  }
 0xdc9   :  { %v928_v3 = vadd.f32 0.5, %v926_v2 }
 0xdca   :  { %932 = vrot.lane.b32.xlu0 %v929_v42, %s1490_s15 }
 0xdcb   :  { %v930_v6 = vmul.f32 %v928_v3, %v864_v53 }
 0xe3c   :  { %v933_v4 = vpop.permute.xlu0 %932 }
 0xe3d   :  { %v935_v5 = vmul.f32 %v933_v4, %v928_v3  ;;  %v1236_v4 = vld [vmem:[%s1824_s7] ss:$0 sm:$0xff] }
 0xe3f   :  { %937 = vrot.lane.b32.xlu1 %v935_v5, %s1490_s15 }
 0xeb1   :  { %v938_v7 = vpop.permute.xlu1 %937 }
 0xeb2   :  { %v940_v8 = vadd.f32 %v938_v7, %v930_v6 }
 0xeb4   :  { %1386 = vtanh.f32 %v940_v8 }
 0xec1   :  { %v1387_v9 = vpop.eup %1386 }
 0xec2   :  { %943 = vrot.lane.b32.xlu0 %v1387_v9, %s1490_s15 }
 0xf34   :  { %v944_v12 = vpop.permute.xlu0 %943 }
 0xf35   :  { %v946_v34 = vmul.f32 %v944_v12, %v929_v42  ;;  %v1349_v42 = vld [vmem:[#allocation7 + $0x10] sm:$0xff]  }
 0xf37   :  { %v947_v37 = vpack.c.bf16 %v946_v34, %v946_v34 }
 0xf39   :  { %1234 = vmatmul.mubr.msk.bf16.vlgmr.msra.gmra.mxu1 %vm507_vm8, %v947_v37 }
 0xf3a   :  { %1288 = vmatprep.mubr.msk.bf16.mxu1 %vm1495_vm0, %v1494_v1  ;;  %1281 = vmatpush3.bf16.msra.mxu1 %v1348_v40 }
 0xf3b   :  { %1282 = vmatprep.subr.bf16.mxu1 %v1494_v1 }
 0xf3e   :  { %1283 = vmatpush3.bf16.msra.mxu1 %v1349_v42 }
 0xf3f   :  { %1284 = vmatprep.subr.bf16.mxu1 %v1494_v1 }
 0xff9   :  { %v989_v13 = vpop.f32.mrf.mxu1 }
 0xffa   :  { %v990_v25 = vadd.f32 %v989_v13, %v948_v23 }
 0xffb   :  { %v991_v26 = vpop.f32.mrf.mxu1 }
 0xffc   :  { %v992_v15 = vadd.f32 %v991_v26, %v949_v14  ;;  %v996_v10 = vmul.f32 0.5, %v990_v25 }
 0xffd   :  { %v993_v16 = vpop.f32.mrf.mxu1 }
 0xffe   :  { %v997_v17 = vmul.f32 %v992_v15, %v1675_v28 }
 0xfff   :  { %v994_v18 = vpop.f32.mrf.mxu1 }
0x1000   :  { %1388 = vtanh.f32 %v997_v17 }
0x1001   :  { %1390 = vtanh.f32 %v996_v10 }
0x100d   :  { %v1389_v19 = vpop.eup %1388 }
0x100e   :  { %v1001_v20 = vmul.f32 %v1389_v19, %v1675_v28  ;;  %v1391_v11 = vpop.eup %1390 }
0x100f   :  { %v1000_v30 = vmul.f32 0.5, %v1391_v11 }
0x1010   :  { %v1003_v21 = vadd.f32 %v1001_v20, %v1682_v32 }
0x1011   :  { %v1002_v31 = vadd.f32 0.5, %v1000_v30 }
0x1012   :  { %1006 = vrot.lane.b32.xlu1 %v1003_v21, %s1490_s15 }
0x1013   :  { %v1004_v39 = vmul.f32 %v1002_v31, %v940_v8 }
0x1084   :  { %v1007_v33 = vpop.permute.xlu1 %1006 }
0x1085   :  { %v1009_v35 = vmul.f32 %v1007_v33, %v1002_v31 }
0x1087   :  { %1011 = vrot.lane.b32.xlu0 %v1009_v35, %s1490_s15 }
0x10f9   :  { %v1012_v41 = vpop.permute.xlu0 %1011 }
0x10fa   :  { %v1014_v43 = vadd.f32 %v1012_v41, %v1004_v39 }
0x10fc   :  { %1392 = vtanh.f32 %v1014_v43 }
0x1109   :  { %v1393_v45 = vpop.eup %1392 }
0x110a   :  { %1017 = vrot.lane.b32.xlu1 %v1393_v45, %s1490_s15 }
0x117c   :  { %v1018_v22 = vpop.permute.xlu1 %1017 }
0x117d   :  { %v1020_v24 = vmul.f32 %v1018_v22, %v1003_v21 }
0x117f   :  { %v1021_v47 = vpack.c.bf16 %v1020_v24, %v1020_v24 }
0x1181   :  { %1235 = vmatmul.mubr.msk.bf16.vlgmr.msra.gmra.mxu0 %vm507_vm8, %v1021_v47 }
0x1241   :  { %v1063_v49 = vpop.f32.mrf.mxu0 }
0x1242   :  { %v1064_v60 = vadd.f32 %v1063_v49, %v1022_v59 }
0x1243   :  { %v1065_v51 = vpop.f32.mrf.mxu0 }
0x1244   :  { %v1066_v52 = vadd.f32 %v1065_v51, %v1023_v50  ;;  %v1070_v61 = vmul.f32 0.5, %v1064_v60 }
0x1245   :  { %v1067_v53 = vpop.f32.mrf.mxu0 }
0x1246   :  { %v1071_v54 = vmul.f32 %v1066_v52, %v1675_v28 }
0x1247   :  { %v1068_v55 = vpop.f32.mrf.mxu0 }
0x1248   :  { %1394 = vtanh.f32 %v1071_v54 }
0x1249   :  { %1396 = vtanh.f32 %v1070_v61 }
0x1255   :  { %v1395_v56 = vpop.eup %1394 }
0x1256   :  { %v1075_v57 = vmul.f32 %v1395_v56, %v1675_v28  ;;  %v1397_v27 = vpop.eup %1396  ;;  %v1350_v28 = vld [vmem:[#allocation7 + $0x8] sm:$0xff]  }
0x1257   :  { %v1074_v36 = vmul.f32 0.5, %v1397_v27  ;;  %1285 = vmatpush3.bf16.msra.mxu1 %v1350_v28 }
0x1258   :  { %v1077_v58 = vadd.f32 %v1075_v57, %v1682_v32  ;;  %1286 = vmatprep.subr.bf16.mxu1 %v1494_v1 }
0x1259   :  { %v1076_v0 = vadd.f32 0.5, %v1074_v36 }
0x125a   :  { %1080 = vrot.lane.b32.xlu0 %v1077_v58, %s1490_s15 }
0x125b   :  { %v1078_v29 = vmul.f32 %v1076_v0, %v1014_v43  ;;  %1287 = vmatpush3.bf16.msra.mxu1 %v1351_v46 }
0x12cc   :  { %v1081_v62 = vpop.permute.xlu0 %1080 }
0x12cd   :  { %v1083_v38 = vmul.f32 %v1081_v62, %v1076_v0 }
0x12cf   :  { %1085 = vrot.lane.b32.xlu1 %v1083_v38, %s1490_s15 }
0x1341   :  { %v1086_v32 = vpop.permute.xlu1 %1085 }
0x1342   :  { %v1088_v44 = vadd.f32 %v1086_v32, %v1078_v29 }
0x1344   :  { %1398 = vtanh.f32 %v1088_v44 }
0x1351   :  { %v1399_v48 = vpop.eup %1398 }
0x1352   :  { %1091 = vrot.lane.b32.xlu0 %v1399_v48, %s1490_s15 }
0x13c4   :  { %v1092_v63 = vpop.permute.xlu0 %1091 }
0x13c5   :  { %v1094_v2 = vmul.f32 %v1092_v63, %v1077_v58 }
0x13c7   :  { %v1095_v3 = vpack.c.bf16 %v1094_v2, %v1094_v2 }
0x13c9   :  { %1289 = vmatmul.mubr.msk.bf16.vlgmr.msra.gmra.mxu1 %vm507_vm8, %v1095_v3 }
0x1489   :  { %v1172_v1 = vpop.f32.mrf.mxu1 }
0x148a   :  { %v1173_v5 = vadd.f32 %v1236_v4, %v1172_v1 }
0x148b   :  { %v1290_v6 = vpop.f32.mrf.mxu1 }
0x148c   :  { %1178 = vst [vmem:[#allocation8] sm:$0x3] %v1173_v5 }
0x148d   :  { %v1175_v7 = vpop.f32.mrf.mxu1 }
0x148e   :  { %1471 = shalt.err (!%p1468_p5)
}
0x148f   :  { %1188 = dma.vmem_to_hbm [thread:$0]  %s1186_s23, 32, %s1825_s8, [#allocation4]   ;;  %v1291_v8 = vpop.f32.mrf.mxu1 }
0x1490   :  { %1484 = dma.done.wait [#allocation4], 32  }
0x1491   :  { %1485 = vsyncadd [#allocation4], 4294967264 }
0x1492   :  { %1192 = vsyncpa [#allocation3], 1 }
0x1493   :  { %1193 = vsyncpa [#allocation6], 1 }
0x1494   :  { %1194 = vsyncpa [#allocation4], 1 }

</bundles_post_ra>
